<compile_context>
chip_gen: v7x
topology: tpu7x:2x2x1
jax: 0.10.0
libtpu: 0.0.40
codegen_flags: <defaults>
</compile_context>

<pallas_src>
import jax
import jax.numpy as jnp
from jax.experimental import pallas as pl
from jax.experimental.pallas import tpu as pltpu

LANE = 128


def _round_up(x, m):
    return ((x + m - 1) // m) * m


def mlp_relu2x20_kernel(x_ref, w1_ref, b1_ref, w2_ref, b2_ref, o_ref):
    # fc1: cast the x tile to bf16 on the fly (VPU), MXU accumulates in f32.
    x = x_ref[...].astype(jnp.bfloat16)
    h = jnp.dot(x, w1_ref[...], preferred_element_type=jnp.float32)
    h = jnp.maximum(h + b1_ref[...], 0.0)
    # Padded hidden columns of h are exactly 0 (zero weight cols, zero bias,
    # ReLU(0) = 0), and the matching padded rows of w2 are 0, so fc2 is exact.
    o = jnp.dot(h.astype(jnp.bfloat16), w2_ref[...],
                preferred_element_type=jnp.float32)
    o = jnp.maximum(o + b2_ref[...], 0.0)
    o_ref[...] = o.astype(o_ref.dtype)


def prepare_relu2x20_params(w1, b1, w2, b2):
    """One-time preprocessing: pad hidden dim to 128 lanes, cast weights to bf16.

    Call once and reuse the result across forward calls (serving regime).
    """
    input_size, hidden = w1.shape
    nclasses = w2.shape[1]
    hidden_p = _round_up(hidden, LANE)

    w1_p = jnp.zeros((input_size, hidden_p), jnp.bfloat16)
    w1_p = w1_p.at[:, :hidden].set(w1.astype(jnp.bfloat16))
    b1_p = jnp.zeros((1, hidden_p), jnp.float32)
    b1_p = b1_p.at[:, :hidden].set(b1.astype(jnp.float32))
    # fc2: pad only the contraction (K) dim to match h; keep N = nclasses.
    w2_p = jnp.zeros((hidden_p, nclasses), jnp.bfloat16)
    w2_p = w2_p.at[:hidden, :].set(w2.astype(jnp.bfloat16))
    b2_p = b2.astype(jnp.float32).reshape(1, nclasses)
    return w1_p, b1_p, w2_p, b2_p


def relu2x20_forward(x, w1_p, b1_p, w2_p, b2_p, *, input_size=784, bm=1024):
    # Mimic torch's x.view(-1, input_size); reshape is a metadata-only op.
    x2d = x.reshape(-1, input_size)
    B = x2d.shape[0]
    hidden_p = w1_p.shape[1]
    nclasses = w2_p.shape[1]

    # Batch tile: as big as useful (x stays f32 in HBM -> multiple of 8 rows).
    bm_eff = _round_up(min(bm, max(B, 1)), 8)
    # v7x megacore: for large batches, size the tile so the grid has an even
    # number of steps (>=2) so both TensorCores stay busy (no-op on v5e/v6e).
    if B >= 1024:
        steps = _round_up(pl.cdiv(B, bm_eff), 2)
        bm_eff = _round_up(pl.cdiv(B, steps), 8)
    grid = (pl.cdiv(B, bm_eff),)

    flops = 2 * B * input_size * hidden_p + 2 * B * hidden_p * nclasses
    bytes_accessed = (
        B * input_size * x2d.dtype.itemsize   # x read (f32, no extra copy pass)
        + input_size * hidden_p * 2           # w1 (bf16, fetched once)
        + hidden_p * nclasses * 2             # w2 (bf16)
        + hidden_p * 4 + nclasses * 4         # biases
        + B * nclasses * 4                    # output at true width
    )

    out = pl.pallas_call(
        mlp_relu2x20_kernel,
        out_shape=jax.ShapeDtypeStruct((B, nclasses), jnp.float32),
        grid_spec=pltpu.PrefetchScalarGridSpec(
            num_scalar_prefetch=0,
            grid=grid,
            in_specs=[
                pl.BlockSpec((bm_eff, input_size), lambda i: (i, 0)),
                pl.BlockSpec((input_size, hidden_p), lambda i: (0, 0)),
                pl.BlockSpec((1, hidden_p), lambda i: (0, 0)),
                pl.BlockSpec((hidden_p, nclasses), lambda i: (0, 0)),
                pl.BlockSpec((1, nclasses), lambda i: (0, 0)),
            ],
            out_specs=pl.BlockSpec((bm_eff, nclasses), lambda i: (i, 0)),
        ),
        compiler_params=pltpu.CompilerParams(
            dimension_semantics=("parallel",),
        ),
        cost_estimate=pl.CostEstimate(
            flops=flops, transcendentals=0, bytes_accessed=bytes_accessed),
    )(x2d, w1_p, b1_p, w2_p, b2_p)
    return out


if __name__ == "__main__":
    input_size = 784
    hidden = 20
    nclasses = 10
    B = 8

    key = jax.random.PRNGKey(0)
    kx, kw1, kb1, kw2, kb2 = jax.random.split(key, 5)

    # Input shaped like MNIST-ish images; forward flattens it (x.view(-1, 784)).
    x = jax.random.normal(kx, (B, 1, 28, 28), dtype=jnp.float32)

    # Deterministic synthetic parameters, stored as (in, out) = PyTorch weight.T
    w1 = jax.random.normal(kw1, (input_size, hidden), dtype=jnp.float32) * 0.05
    b1 = jax.random.normal(kb1, (hidden,), dtype=jnp.float32) * 0.05
    w2 = jax.random.normal(kw2, (nclasses and hidden, nclasses), dtype=jnp.float32) * 0.05
    b2 = jax.random.normal(kb2, (nclasses,), dtype=jnp.float32) * 0.05

    # One-time weight prep (hoisted out of the forward, cached by the caller).
    params = prepare_relu2x20_params(w1, b1, w2, b2)

    out = relu2x20_forward(x, *params, input_size=input_size)
    out = jax.block_until_ready(out)

    # Pure-JAX reference with the same bf16 rounding applied to the matmul
    # operands (the kernel accumulates in f32, so results should match tightly).
    # NOTE: bf16 operands mean bit-level parity with a pure-f32 PyTorch model
    # is not expected; accuracy impact is negligible for this tiny MLP.
    x2d = x.reshape(-1, input_size)
    xb = x2d.astype(jnp.bfloat16).astype(jnp.float32)
    w1b = w1.astype(jnp.bfloat16).astype(jnp.float32)
    h = jnp.maximum(xb @ w1b + b1, 0.0)
    hb = h.astype(jnp.bfloat16).astype(jnp.float32)
    w2b = w2.astype(jnp.bfloat16).astype(jnp.float32)
    ref = jnp.maximum(hb @ w2b + b2, 0.0)

    assert out.shape == (B, nclasses), out.shape
    assert jnp.allclose(out, ref, atol=2e-3, rtol=2e-3), "mismatch vs reference"
    print("KERNEL_OK")
</pallas_src>

<mosaic_0001>
module attributes {stable_mosaic.version = 11 : i64} {
  func.func @mlp_relu2x20_kernel(%arg0: i32, %arg1: memref<8x784xf32, #tpu.memory_space<vmem>>, %arg2: memref<784x128xbf16, #tpu.memory_space<vmem>>, %arg3: memref<1x128xf32, #tpu.memory_space<vmem>>, %arg4: memref<128x10xbf16, #tpu.memory_space<vmem>>, %arg5: memref<1x10xf32, #tpu.memory_space<vmem>>, %arg6: memref<8x10xf32, #tpu.memory_space<vmem>>) attributes {dimension_semantics = [#tpu.dimension_semantics<parallel>], iteration_bounds = array<i64: 1>, scalar_prefetch = 0 : i64, scratch_operands = 0 : i64, tpu.core_type = #tpu.core_type<tc>, window_params = [{transform_indices = @transform_0, window_bounds = array<i64: 8, 784>}, {pipeline_mode = #tpu.pipeline_mode<synchronous>, transform_indices = @transform_1, window_bounds = array<i64: 784, 128>}, {pipeline_mode = #tpu.pipeline_mode<synchronous>, transform_indices = @transform_2, window_bounds = array<i64: 1, 128>}, {pipeline_mode = #tpu.pipeline_mode<synchronous>, transform_indices = @transform_3, window_bounds = array<i64: 128, 10>}, {pipeline_mode = #tpu.pipeline_mode<synchronous>, transform_indices = @transform_4, window_bounds = array<i64: 1, 10>}, {transform_indices = @transform_5, window_bounds = array<i64: 8, 10>}]} {
    %c0 = arith.constant 0 : index
    %c0_0 = arith.constant 0 : index
    %0 = vector.load %arg1[%c0, %c0_0] : memref<8x784xf32, #tpu.memory_space<vmem>>, vector<8x784xf32>
    %1 = arith.truncf %0 : vector<8x784xf32> to vector<8x784xbf16>
    %c0_1 = arith.constant 0 : index
    %c0_2 = arith.constant 0 : index
    %2 = vector.load %arg2[%c0_1, %c0_2] : memref<784x128xbf16, #tpu.memory_space<vmem>>, vector<784x128xbf16>
    %cst = arith.constant dense<0.000000e+00> : vector<8x128xf32>
    %3 = tpu.matmul %1, %2, %cst {dimension_numbers = #tpu.dot_dimension_numbers<[1], [0], [0], [1], [0, 0, 1, 1], [], []>} : vector<8x784xbf16>, vector<784x128xbf16>, vector<8x128xf32> -> vector<8x128xf32>
    %c0_3 = arith.constant 0 : index
    %c0_4 = arith.constant 0 : index
    %4 = vector.load %arg3[%c0_3, %c0_4] : memref<1x128xf32, #tpu.memory_space<vmem>>, vector<1x128xf32>
    %5 = vector.broadcast %4 : vector<1x128xf32> to vector<8x128xf32>
    %6 = arith.addf %3, %5 : vector<8x128xf32>
    %cst_5 = arith.constant 0.000000e+00 : f32
    %7 = vector.broadcast %cst_5 : f32 to vector<8x128xf32>
    %8 = arith.maximumf %6, %7 : vector<8x128xf32>
    %9 = arith.truncf %8 : vector<8x128xf32> to vector<8x128xbf16>
    %c0_6 = arith.constant 0 : index
    %c0_7 = arith.constant 0 : index
    %10 = vector.load %arg4[%c0_6, %c0_7] : memref<128x10xbf16, #tpu.memory_space<vmem>>, vector<128x10xbf16>
    %cst_8 = arith.constant dense<0.000000e+00> : vector<8x10xf32>
    %11 = tpu.matmul %9, %10, %cst_8 {dimension_numbers = #tpu.dot_dimension_numbers<[1], [0], [0], [1], [0, 0, 1, 1], [], []>} : vector<8x128xbf16>, vector<128x10xbf16>, vector<8x10xf32> -> vector<8x10xf32>
    %c0_9 = arith.constant 0 : index
    %c0_10 = arith.constant 0 : index
    %12 = vector.load %arg5[%c0_9, %c0_10] : memref<1x10xf32, #tpu.memory_space<vmem>>, vector<1x10xf32>
    %13 = vector.broadcast %12 : vector<1x10xf32> to vector<8x10xf32>
    %14 = arith.addf %11, %13 : vector<8x10xf32>
    %cst_11 = arith.constant 0.000000e+00 : f32
    %15 = vector.broadcast %cst_11 : f32 to vector<8x10xf32>
    %16 = arith.maximumf %14, %15 : vector<8x10xf32>
    %c0_12 = arith.constant 0 : index
    %c0_13 = arith.constant 0 : index
    %17 = vector.load %arg6[%c0_12, %c0_13] : memref<8x10xf32, #tpu.memory_space<vmem>>, vector<8x10xf32>
    tpu.vector_store %arg6[%c0_12, %c0_13], %16 {strides = array<i32>} : memref<8x10xf32, #tpu.memory_space<vmem>>, vector<8x10xf32>,
    return
  }
  func.func @transform_0(%arg0: i32) -> (i32, i32) {
    %c0_i32 = arith.constant 0 : i32
    %c0_i32_0 = arith.constant 0 : i32
    return %arg0, %c0_i32 : i32, i32
  }
  func.func @transform_1(%arg0: i32) -> (i32, i32) {
    %c0_i32 = arith.constant 0 : i32
    %c0_i32_0 = arith.constant 0 : i32
    %c0_i32_1 = arith.constant 0 : i32
    return %c0_i32, %c0_i32_0 : i32, i32
  }
  func.func @transform_2(%arg0: i32) -> (i32, i32) {
    %c0_i32 = arith.constant 0 : i32
    %c0_i32_0 = arith.constant 0 : i32
    %c0_i32_1 = arith.constant 0 : i32
    return %c0_i32, %c0_i32_0 : i32, i32
  }
  func.func @transform_3(%arg0: i32) -> (i32, i32) {
    %c0_i32 = arith.constant 0 : i32
    %c0_i32_0 = arith.constant 0 : i32
    %c0_i32_1 = arith.constant 0 : i32
    return %c0_i32, %c0_i32_0 : i32, i32
  }
  func.func @transform_4(%arg0: i32) -> (i32, i32) {
    %c0_i32 = arith.constant 0 : i32
    %c0_i32_0 = arith.constant 0 : i32
    %c0_i32_1 = arith.constant 0 : i32
    return %c0_i32, %c0_i32_0 : i32, i32
  }
  func.func @transform_5(%arg0: i32) -> (i32, i32) {
    %c0_i32 = arith.constant 0 : i32
    %c0_i32_0 = arith.constant 0 : i32
    return %arg0, %c0_i32 : i32, i32
  }
}

</mosaic_0001>

<bundles_post_ra>
// kernel: tpu_custom_call.1
= control target key start
LH: loop header
LB: loop body
LE: loop exit
PB: predicated region body
PF: predicated region fallthrough
CT: control target
= control target key end

     0   :  { %10 = vsyncpa [#allocation3], 0  ;;  %s1142_s0 = inlined_call_operand.vmem [shape: f32[8,784], index: 0, kind: input, shape index: {}]   ;;  %s1143_s1 = inlined_call_operand.hbm [shape: bf16[784,128], index: 1, kind: input, shape index: {}]   ;;  %s1144_s2 = inlined_call_operand.vmem [shape: f32[1,128], index: 2, kind: input, shape index: {}]   ;;  %s1145_s3 = inlined_call_operand.vmem [shape: bf16[128,10], index: 3, kind: input, shape index: {}]   ;;  %s1146_s4 = inlined_call_operand.vmem [shape: f32[1,10], index: 4, kind: input, shape index: {}]   ;;  %s1147_s5 = inlined_call_operand.hbm [shape: f32[8,10], index: 5, kind: output, shape index: {}]  }
   0x1   :  { %11 = vsyncpa [#allocation4], 0  ;;  %s1018_s18 = smov [#allocation2]   ;;  %s970_s22 = scalar_lea.hbm %s1143_s1, 6272 }
   0x2   :  { %s19_s19 = sshll.u32 %s1018_s18, 4  ;;  %p971_p0 = scmp.ne.s32.totalorder %s1143_s1, %s970_s22  ;;  %s20_s19 = int_to_ptr.vmem [resolvable:$true] %s19_s19 }
   0x3   :  { %p974_p1 = scmp.lt.u32.totalorder %s970_s22, %s1143_s1 }
   0x5   :  { %p976_p2 = pnand %p974_p1, %p971_p0 }
   0x7   :  { %979 = shalt.err (!%p976_p2)
}
   0x8   :  { %s980_s27 = scalar_lea.vmem %s20_s19, 6272  ;;  %p985_p4 = scmp.lt.s32.totalorder %s20_s19, %s20_s19 }
   0x9   :  { %p981_p3 = scmp.ne.s32.totalorder %s20_s19, %s980_s27  ;;  %p986_p5 = scmp.lt.s32.totalorder %s980_s27, %s980_s27 }
   0xb   :  { %p987_p6 = por %p986_p5, %p985_p4 }
   0xd   :  { %p988_p7 = pnand %p987_p6, %p981_p3 }
   0xf   :  { %991 = shalt.err (!%p988_p7)
}
  0x10   :  { %s1019_s28 = smov 64   ;;  %s1020_s29 = smov 4  }
  0x11   :  { %25 = dma.hbm_to_vmem [thread:$0]  %s1143_s1, 6272, %s20_s19, [#allocation3], %s1019_s28, %s1019_s28, %s1020_s29  }
  0x12   :  { %1014 = dma.done.wait [#allocation3], 6272  }
  0x13   :  { %1015 = vsyncadd [#allocation3], 4294961024  ;;  %v913_v0 = vld [vmem:[#allocation2 + $0x40] sm:$0xff]   ;;  %v917_v4 = vld [vmem:[#allocation2 + $0x48] sm:$0xff]   ;;  %v1021_v44 = vmov 0.0   ;;  %vm1022_vm0 = vmmov 0  }
  0x14   :  { %v914_v1 = vld [vmem:[#allocation2] sm:$0xff]   ;;  %804 = vmatprep.subr.bf16.mxu0 %v913_v0  ;;  %v918_v5 = vld [vmem:[#allocation2 + $0x8] sm:$0xff]   ;;  %v921_v8 = vld [vmem:[#allocation2 + $0x50] sm:$0xff]   ;;  %vm449_vm1 = vcmask 130048   ;;  %s1023_s11 = smov [#allocation5]   ;;  %vm727_vm2 = vcmask 80896  }
  0x15   :  { %v915_v2 = vld [vmem:[#allocation2 + $0xc0] sm:$0xff]   ;;  %805 = vmatpush3.bf16.msra.mxu0 %v914_v1  ;;  %v919_v6 = vld [vmem:[#allocation2 + $0xc8] sm:$0xff]   ;;  %v922_v9 = vld [vmem:[#allocation2 + $0x10] sm:$0xff]   ;;  %s735_s12 = sshll.u32 %s1023_s11, 4  ;;  %s736_s12 = int_to_ptr.vmem [resolvable:$true] %s735_s12 }
  0x16   :  { %v916_v3 = vld [vmem:[#allocation2 + $0x80] sm:$0xff]   ;;  %826 = vmatprep.subr.bf16.mxu1 %v915_v2  ;;  %806 = vmatprep.subr.bf16.mxu0 %v917_v4  ;;  %v920_v7 = vld [vmem:[#allocation2 + $0x88] sm:$0xff]   ;;  %v923_v10 = vld [vmem:[#allocation2 + $0xd0] sm:$0xff]   ;;  %s992_s13 = scalar_lea.vmem %s736_s12, 128  ;;  %p997_p9 = scmp.lt.s32.totalorder %s736_s12, %s736_s12 }
  0x17   :  { %827 = vmatpush3.bf16.msra.mxu1 %v916_v3  ;;  %v924_v11 = vld [vmem:[#allocation2 + $0x90] sm:$0xff]   ;;  %v925_v12 = vld [vmem:[#allocation2 + $0x58] sm:$0xff]   ;;  %v929_v16 = vld [vmem:[#allocation2 + $0x60] sm:$0xff]   ;;  %p993_p8 = scmp.ne.s32.totalorder %s736_s12, %s992_s13  ;;  %p998_p10 = scmp.lt.s32.totalorder %s992_s13, %s992_s13 }
  0x18   :  { %828 = vmatprep.subr.bf16.mxu1 %v919_v6  ;;  %v926_v13 = vld [vmem:[#allocation2 + $0x18] sm:$0xff]   ;;  %v930_v17 = vld [vmem:[#allocation2 + $0x20] sm:$0xff]   ;;  %v933_v20 = vld [vmem:[#allocation2 + $0x68] sm:$0xff]  }
  0x19   :  { %807 = vmatpush3.bf16.msra.mxu0 %v918_v5  ;;  %v927_v14 = vld [vmem:[#allocation2 + $0xd8] sm:$0xff]   ;;  %v931_v18 = vld [vmem:[#allocation2 + $0xe0] sm:$0xff]   ;;  %v934_v21 = vld [vmem:[#allocation2 + $0x28] sm:$0xff]   ;;  %p999_p11 = por %p998_p10, %p997_p9 }
  0x1a   :  { %808 = vmatprep.subr.bf16.mxu0 %v921_v8  ;;  %v928_v15 = vld [vmem:[#allocation2 + $0x98] sm:$0xff]   ;;  %v932_v19 = vld [vmem:[#allocation2 + $0xa0] sm:$0xff]   ;;  %v935_v22 = vld [vmem:[#allocation2 + $0xe8] sm:$0xff]  }
  0x1b   :  { %829 = vmatpush3.bf16.msra.mxu1 %v920_v7  ;;  %v936_v23 = vld [vmem:[#allocation2 + $0xa8] sm:$0xff]   ;;  %v937_v24 = vld [vmem:[#allocation2 + $0x70] sm:$0xff]   ;;  %v941_v28 = vld [vmem:[#allocation2 + $0x78] sm:$0xff]   ;;  %p1000_p12 = pnand %p999_p11, %p993_p8 }
  0x1c   :  { %830 = vmatprep.subr.bf16.mxu1 %v923_v10  ;;  %v938_v25 = vld [vmem:[#allocation2 + $0x30] sm:$0xff]   ;;  %v942_v29 = vld [vmem:[#allocation2 + $0x38] sm:$0xff]   ;;  %v37_v31 = vld [vmem:[%s1142_s0 + $0x8] sm:$0xff] }
  0x1d   :  { %809 = vmatpush3.bf16.msra.mxu0 %v922_v9  ;;  %v939_v26 = vld [vmem:[#allocation2 + $0xf0] sm:$0xff]   ;;  %v943_v30 = vld [vmem:[#allocation2 + $0xf8] sm:$0xff]   ;;  %v44_v32 = vpack.c.bf16 %v37_v31, %v37_v31  ;;  %v36_v34 = vld [vmem:[%s1142_s0] sm:$0xff] }
  0x1e   :  { %810 = vmatprep.subr.bf16.mxu0 %v925_v12  ;;  %v940_v27 = vld [vmem:[#allocation2 + $0xb0] sm:$0xff]   ;;  %v944_v33 = vld [vmem:[#allocation2 + $0xb8] sm:$0xff]   ;;  %v43_v35 = vpack.c.bf16 %v36_v34, %v36_v34  ;;  %v945_v36 = vld [vmem:[#allocation2 + $0x140] sm:$0xff]  }
  0x1f   :  { %831 = vmatpush3.bf16.msra.mxu1 %v924_v11  ;;  %v39_v37 = vld [vmem:[%s1142_s0 + $0x18] sm:$0xff]  ;;  %485 = vmatprep.mubr.bf16.mxu0 %v44_v32  ;;  %v946_v39 = vld [vmem:[#allocation2 + $0x100] sm:$0xff]   ;;  %v38_v40 = vld [vmem:[%s1142_s0 + $0x10] sm:$0xff] }
  0x20   :  { %832 = vmatprep.subr.bf16.mxu1 %v927_v14  ;;  %v46_v38 = vpack.c.bf16 %v39_v37, %v39_v37  ;;  %v45_v41 = vpack.c.bf16 %v38_v40, %v38_v40  ;;  %v947_v42 = vld [vmem:[#allocation2 + $0x148] sm:$0xff]   ;;  %v949_v45 = vld [vmem:[#allocation2 + $0x150] sm:$0xff]   ;;  %v951_v47 = vld [vmem:[#allocation2 + $0x158] sm:$0xff]  }
  0x21   :  { %811 = vmatpush3.bf16.msra.mxu0 %v926_v13  ;;  %v948_v43 = vld [vmem:[#allocation2 + $0x108] sm:$0xff]   ;;  %v950_v46 = vld [vmem:[#allocation2 + $0x110] sm:$0xff]   ;;  %v952_v48 = vld [vmem:[#allocation2 + $0x118] sm:$0xff]  }
  0x22   :  { %812 = vmatprep.subr.bf16.mxu0 %v929_v16  ;;  %525 = vmatprep.mubr.bf16.mxu1 %v46_v38  ;;  %v953_v49 = vld [vmem:[#allocation2 + $0x160] sm:$0xff]   ;;  %v955_v51 = vld [vmem:[#allocation2 + $0x168] sm:$0xff]   ;;  %v957_v55 = vld [vmem:[#allocation2 + $0x170] sm:$0xff]  }
  0x23   :  { %833 = vmatpush3.bf16.msra.mxu1 %v928_v15  ;;  %v954_v50 = vld [vmem:[#allocation2 + $0x120] sm:$0xff]   ;;  %v956_v52 = vld [vmem:[#allocation2 + $0x128] sm:$0xff]   ;;  %v42_v57 = vld [vmem:[%s1142_s0 + $0x30] sm:$0xff] }
  0x24   :  { %834 = vmatprep.subr.bf16.mxu1 %v931_v18  ;;  %v961_v53 = vld [vmem:[#allocation2 + $0x180] sm:$0xff]   ;;  %v41_v54 = vld [vmem:[%s1142_s0 + $0x28] sm:$0xff]  ;;  %v49_v58 = vpack.c.bf16 %v42_v57, %v42_v57  ;;  %v958_v59 = vld [vmem:[#allocation2 + $0x130] sm:$0xff]  }
  0x25   :  { %813 = vmatpush3.bf16.msra.mxu0 %v930_v17  ;;  %v48_v56 = vpack.c.bf16 %v41_v54, %v41_v54  ;;  %v959_v60 = vld [vmem:[#allocation2 + $0x178] sm:$0xff]   ;;  %v40_v62 = vld [vmem:[%s1142_s0 + $0x20] sm:$0xff]  ;;  %v963_v1 = vld [vmem:[%s1145_s3 + $0x8] sm:$0xff]  }
  0x26   :  { %814 = vmatprep.subr.bf16.mxu0 %v933_v20  ;;  %v960_v61 = vld [vmem:[#allocation2 + $0x138] sm:$0xff]   ;;  %v47_v63 = vpack.c.bf16 %v40_v62, %v40_v62  ;;  %v962_v0 = vld [vmem:[%s1145_s3] sm:$0xff]   ;;  %v964_v2 = vld [vmem:[%s1145_s3 + $0x10] sm:$0xff]  }
  0x27   :  { %835 = vmatpush3.bf16.msra.mxu1 %v932_v19  ;;  %v965_v3 = vld [vmem:[%s1145_s3 + $0x18] sm:$0xff]   ;;  %v966_v4 = vld [vmem:[%s1145_s3 + $0x20] sm:$0xff]   ;;  %v967_v5 = vld [vmem:[%s1145_s3 + $0x28] sm:$0xff]  }
  0x28   :  { %836 = vmatprep.subr.bf16.mxu1 %v935_v22  ;;  %v968_v6 = vld [vmem:[%s1145_s3 + $0x30] sm:$0xff]   ;;  %v969_v7 = vld [vmem:[%s1145_s3 + $0x38] sm:$0xff]   ;;  %v744_v9 = vld [vmem:[%s1144_s2] ss:$0 sm:$0xff] }
  0x29   :  { %815 = vmatpush3.bf16.msra.mxu0 %v934_v21  ;;  %v795_v34 = vld [vmem:[%s1146_s4] ss:$0 sm:$0xff] }
  0x2a   :  { %816 = vmatprep.subr.bf16.mxu0 %v937_v24 }
  0x2b   :  { %837 = vmatpush3.bf16.msra.mxu1 %v936_v23 }
  0x2c   :  { %838 = vmatprep.subr.bf16.mxu1 %v939_v26 }
  0x2d   :  { %817 = vmatpush3.bf16.msra.mxu0 %v938_v25 }
  0x2e   :  { %818 = vmatprep.subr.bf16.mxu0 %v941_v28 }
  0x2f   :  { %839 = vmatpush3.bf16.msra.mxu1 %v940_v27 }
  0x30   :  { %840 = vmatprep.subr.bf16.mxu1 %v943_v30 }
  0x31   :  { %819 = vmatpush3.bf16.msra.mxu0 %v942_v29 }
  0x32   :  { %848 = vmatprep.subr.bf16.mxu0 %v945_v36 }
  0x33   :  { %841 = vmatpush3.bf16.msra.mxu1 %v944_v33 }
  0x34   :  { %486 = vmatmul.mubr.bf16.vlgmr.msra.gmra.mrb[0].mxu0 %v43_v35  ;;  %881 = vmatprep.subr.bf16.mxu1 %v1021_v44 }
  0x35   :  { %849 = vmatpush3.bf16.msra.mxu0 %v946_v39  ;;  %565 = vmatprep.mubr.bf16.mxu0 %v48_v56 }
  0x36   :  { %526 = vmatmul.mubr.bf16.vlgmr.msra.gmra.mrb[0].mxu1 %v45_v41  ;;  %850 = vmatprep.subr.bf16.mxu0 %v947_v42 }
  0x37   :  { %883 = vmatprep.mubr.msk.bf16.mxu1 %vm1022_vm0, %v1021_v44  ;;  %882 = vmatpush3.bf16.msra.mxu1 %v961_v53 }
  0x38   :  { %887 = vmatprep.subr.bf16.mxu1 %v1021_v44 }
  0x39   :  { %851 = vmatpush3.bf16.msra.mxu0 %v948_v43 }
  0x3a   :  { %852 = vmatprep.subr.bf16.mxu0 %v949_v45 }
  0x3d   :  { %853 = vmatpush3.bf16.msra.mxu0 %v950_v46 }
  0x3e   :  { %854 = vmatprep.subr.bf16.mxu0 %v951_v47  ;;  %884 = vmatmul.mubr.msk.bf16.vlgmr.msra.gmra.mrb[4].mxu1 %vm449_vm1, %v49_v58 }
  0x3f   :  { %903 = vmatprep.mubr.msk.bf16.mxu1 %vm1022_vm0, %v1021_v44  ;;  %888 = vmatpush3.bf16.msra.mxu1 %v962_v0 }
  0x40   :  { %889 = vmatprep.subr.bf16.mxu1 %v1021_v44 }
  0x41   :  { %855 = vmatpush3.bf16.msra.mxu0 %v952_v48 }
  0x42   :  { %856 = vmatprep.subr.bf16.mxu0 %v953_v49 }
  0x43   :  { %890 = vmatpush3.bf16.msra.mxu1 %v963_v1 }
  0x44   :  { %891 = vmatprep.subr.bf16.mxu1 %v1021_v44 }
  0x45   :  { %857 = vmatpush3.bf16.msra.mxu0 %v954_v50 }
  0x46   :  { %858 = vmatprep.subr.bf16.mxu0 %v955_v51 }
  0x47   :  { %892 = vmatpush3.bf16.msra.mxu1 %v964_v2 }
  0x48   :  { %893 = vmatprep.subr.bf16.mxu1 %v1021_v44 }
  0x49   :  { %859 = vmatpush3.bf16.msra.mxu0 %v956_v52 }
  0x4a   :  { %860 = vmatprep.subr.bf16.mxu0 %v957_v55 }
  0x4b   :  { %894 = vmatpush3.bf16.msra.mxu1 %v965_v3 }
  0x4c   :  { %895 = vmatprep.subr.bf16.mxu1 %v1021_v44 }
  0x4d   :  { %861 = vmatpush3.bf16.msra.mxu0 %v958_v59 }
  0x4e   :  { %862 = vmatprep.subr.bf16.mxu0 %v959_v60 }
  0x4f   :  { %896 = vmatpush3.bf16.msra.mxu1 %v966_v4 }
  0x50   :  { %897 = vmatprep.subr.bf16.mxu1 %v1021_v44 }
  0x51   :  { %863 = vmatpush3.bf16.msra.mxu0 %v960_v61 }
  0x53   :  { %898 = vmatpush3.bf16.msra.mxu1 %v967_v5 }
  0x54   :  { %566 = vmatmul.mubr.bf16.vlgmr.msra.gmra.mrb[4].mxu0 %v47_v63  ;;  %899 = vmatprep.subr.bf16.mxu1 %v1021_v44 }
  0x57   :  { %900 = vmatpush3.bf16.msra.mxu1 %v968_v6 }
  0x58   :  { %901 = vmatprep.subr.bf16.mxu1 %v1021_v44 }
  0x5b   :  { %902 = vmatpush3.bf16.msra.mxu1 %v969_v7 }
 0x107   :  { %v820_v8 = vpop.f32.mrb[0].mxu0 }
 0x108   :  { %v821_v10 = vpop.f32.mrb[1].mxu0 }
 0x109   :  { %v822_v11 = vadd.f32 %v821_v10, %v820_v8  ;;  %v823_v12 = vpop.f32.mrb[2].mxu0  ;;  %v842_v13 = vpop.f32.mrb[0].mxu1 }
 0x10a   :  { %v824_v14 = vpop.f32.mrb[3].mxu0  ;;  %v843_v16 = vpop.f32.mrb[1].mxu1 }
 0x10b   :  { %v488_v15 = vadd.f32 %v822_v11, %v744_v9  ;;  %v844_v17 = vadd.f32 %v843_v16, %v842_v13  ;;  %v845_v18 = vpop.f32.mrb[2].mxu1 }
 0x10c   :  { %v846_v19 = vpop.f32.mrb[3].mxu1 }
 0x10d   :  { %v528_v20 = vadd.f32 %v844_v17, %v488_v15 }
 0x111   :  { %v607_v21 = vpop.f32.mrb[4].mxu1 }
 0x112   :  { %v885_v22 = vpop.f32.mrb[5].mxu1 }
 0x113   :  { %v610_v23 = vpop.f32.mrb[6].mxu1 }
 0x114   :  { %v886_v24 = vpop.f32.mrb[7].mxu1 }
 0x127   :  { %v864_v25 = vpop.f32.mrb[4].mxu0 }
 0x128   :  { %v865_v26 = vpop.f32.mrb[5].mxu0 }
 0x129   :  { %v866_v27 = vadd.f32 %v865_v26, %v864_v25  ;;  %v867_v28 = vpop.f32.mrb[6].mxu0 }
 0x12a   :  { %v868_v29 = vpop.f32.mrb[7].mxu0 }
 0x12b   :  { %v568_v30 = vadd.f32 %v866_v27, %v528_v20 }
 0x12d   :  { %v608_v31 = vadd.f32 %v607_v21, %v568_v30 }
 0x12f   :  { %v613_v32 = vmax.f32 %v608_v31, 0.0 }
 0x131   :  { %v614_v33 = vpack.c.bf16 %v613_v32, %v613_v32 }
 0x133   :  { %904 = vmatmul.mubr.bf16.vlgmr.msra.gmra.mrb[8].mxu1 %v614_v33 }
 0x206   :  { %v720_v35 = vpop.f32.mrb[8].mxu1 }
 0x207   :  { %v721_v36 = vadd.f32 %v795_v34, %v720_v35  ;;  %v905_v37 = vpop.f32.mrb[9].mxu1 }
 0x208   :  { %v723_v38 = vpop.f32.mrb[10].mxu1 }
 0x209   :  { %v726_v39 = vmax.f32 %v721_v36, 0.0  ;;  %v906_v40 = vpop.f32.mrb[11].mxu1 }
 0x20b   :  { %728 = vst.msk [vmem:[#allocation5] sm:$0xff] %vm727_vm2, %v726_v39 }
 0x20c   :  { %1003 = shalt.err (!%p1000_p12)
}
 0x20d   :  { %s1004_s15 = scalar_lea.hbm %s1147_s5, 128 }
 0x20e   :  { %p1005_p13 = scmp.ne.s32.totalorder %s1147_s5, %s1004_s15  ;;  %p1008_p0 = scmp.lt.u32.totalorder %s1004_s15, %s1147_s5 }
 0x210   :  { %p1010_p1 = pnand %p1008_p0, %p1005_p13 }
 0x212   :  { %1013 = shalt.err (!%p1010_p1)
}
 0x213   :  { %738 = dma.vmem_to_hbm [thread:$0]  %s736_s12, 128, %s1147_s5, [#allocation4]  }
 0x214   :  { %1016 = dma.done.wait [#allocation4], 128  }
 0x215   :  { %1017 = vsyncadd [#allocation4], 4294967168 }
 0x216   :  { %742 = vsyncpa [#allocation3], 1 }
 0x217   :  { %743 = vsyncpa [#allocation4], 1 }

</bundles_post_ra>
